<compile_context>
chip_gen: v5e
topology: v5e:2x2
jax: 0.10.0
libtpu: 0.0.40
codegen_flags: <defaults>
</compile_context>

<pallas_src>
import functools

import jax
import jax.numpy as jnp
from jax.experimental import pallas as pl
from jax.experimental.pallas import tpu as pltpu


def _fused_mlp_kernel(x_ref, w1_ref, b1_ref, w2_ref, b2_ref, o_ref, *,
                      hidden_pad, heads_per_block, num_head_blocks):
    """One grid step: a block of B rows x a block of G heads.

    x_ref : (TB, D)            f32 or bf16
    w1_ref: (D, G*Hp)          f32 or bf16 (fused first-layer weights)
    b1_ref: (1, G*Hp)          f32
    w2_ref: (1, G*Hp)          f32 (flattened second-layer weights)
    b2_ref: (dim_y,)           f32, resident in SMEM
    o_ref : (TB, dim_y)        f32, resident across the head axis
    """
    hb = pl.program_id(1)

    # Single fused MXU matmul for all heads in this block (f32 accumulation).
    h = jnp.dot(x_ref[...], w1_ref[...], preferred_element_type=jnp.float32)
    h = jnp.maximum(h + b1_ref[...], 0.0)          # bias + ReLU on the VPU

    # Second layer: VPU multiply + per-head lane reduction (no N=1 MXU matmul).
    hw = h * w2_ref[...]                           # (TB, G*Hp)
    cols = []
    for g in range(heads_per_block):               # static, small unrolled loop
        seg = hw[:, g * hidden_pad:(g + 1) * hidden_pad]          # 128-aligned slice
        col = jnp.sum(seg, axis=-1, keepdims=True)                # (TB, 1), XLU reduce
        col = col + b2_ref[hb * heads_per_block + g]              # scalar bias from SMEM
        cols.append(col)
    block = cols[0] if heads_per_block == 1 else jnp.concatenate(cols, axis=-1)
    block = block.astype(o_ref.dtype)

    if num_head_blocks == 1:
        o_ref[...] = block                          # single lane-dense store
    else:
        # Output block is resident across the (arbitrary) head axis; each step
        # fills its own group of columns.
        o_ref[:, pl.ds(hb * heads_per_block, heads_per_block)] = block


def fully_connected_networks(x, w1, b1, w2, b2, *, use_bf16_weights=False,
                             b_tile=256, vmem_limit_bytes=32 * 1024 * 1024):
    """x: (B, dim_X); w1: (dim_y, dim_X, H); b1: (dim_y, 1, H);
    w2: (dim_y, H, 1); b2: (dim_y, 1, 1).  Returns (B, dim_y) float32."""
    B, D = x.shape
    dim_y, d2, H = w1.shape
    assert d2 == D

    # --- Pad hidden width to a multiple of 128 lanes (padded units output 0). ---
    Hp = ((H + 127) // 128) * 128
    pad = Hp - H
    if pad:
        w1 = jnp.pad(w1, ((0, 0), (0, 0), (0, pad)))
        b1 = jnp.pad(b1, ((0, 0), (0, 0), (0, pad)))
        w2 = jnp.pad(w2, ((0, 0), (0, pad), (0, 0)))

    # --- Head-fused layouts (one-time relayout in XLA). Column order = y*Hp + h. ---
    w1_flat = jnp.transpose(w1, (1, 0, 2)).reshape(D, dim_y * Hp)
    b1_row = b1.reshape(1, dim_y * Hp).astype(jnp.float32)
    w2_row = w2.reshape(1, dim_y * Hp).astype(jnp.float32)
    b2_vec = b2.reshape(dim_y).astype(jnp.float32)

    if use_bf16_weights:
        x_in = x.astype(jnp.bfloat16)
        w1_flat = w1_flat.astype(jnp.bfloat16)
    else:
        x_in = x.astype(jnp.float32)
        w1_flat = w1_flat.astype(jnp.float32)
    itemsize = 2 if use_bf16_weights else 4

    # --- Batch tiling (parallel axis; feeds both v7x TensorCores when B is large). ---
    if B <= b_tile:
        TB, nb = B, 1
    else:
        TB, nb = b_tile, pl.cdiv(B, b_tile)         # b_tile is a multiple of 8

    # --- Head-block size: largest divisor of dim_y whose fused W1 block (double
    #     buffered) + activations fit a conservative VMEM budget (v7x has 64 MiB). ---
    budget = 20 * 1024 * 1024

    def step_bytes(g):
        w1_blk = D * g * Hp * itemsize
        rows = 2 * g * Hp * 4                       # b1_row + w2_row blocks
        x_blk = TB * D * itemsize
        acts = 2 * TB * g * Hp * 4                  # h and h*w2 temporaries
        out_blk = TB * dim_y * 4
        return 2 * (w1_blk + rows + x_blk) + acts + out_blk

    G = 1
    for cand in range(dim_y, 0, -1):
        if dim_y % cand == 0 and step_bytes(cand) <= budget:
            G = cand
            break
    nh = dim_y // G

    kernel = functools.partial(_fused_mlp_kernel, hidden_pad=Hp,
                               heads_per_block=G, num_head_blocks=nh)

    out = pl.pallas_call(
        kernel,
        out_shape=jax.ShapeDtypeStruct((B, dim_y), jnp.float32),
        grid_spec=pltpu.PrefetchScalarGridSpec(
            num_scalar_prefetch=0,
            grid=(nb, nh),
            in_specs=[
                pl.BlockSpec((TB, D), lambda bi, hi: (bi, 0)),          # X block
                pl.BlockSpec((D, G * Hp), lambda bi, hi: (0, hi)),      # fused W1
                pl.BlockSpec((1, G * Hp), lambda bi, hi: (0, hi)),      # b1 row
                pl.BlockSpec((1, G * Hp), lambda bi, hi: (0, hi)),      # w2 row
                pl.BlockSpec(memory_space=pltpu.MemorySpace.SMEM),      # b2 scalars
            ],
            out_specs=pl.BlockSpec((TB, dim_y), lambda bi, hi: (bi, 0)),
        ),
        compiler_params=pltpu.CompilerParams(
            dimension_semantics=("parallel", "arbitrary"),
            vmem_limit_bytes=vmem_limit_bytes,
        ),
    )(x_in, w1_flat, b1_row, w2_row, b2_vec)

    return out


def reference(x, w1, b1, w2, b2):
    """Plain-JAX reference matching the PyTorch forward."""
    cols = []
    for i in range(w1.shape[0]):
        h = jnp.maximum(x @ w1[i] + b1[i], 0.0)
        cols.append((h @ w2[i] + b2[i]).squeeze())
    return jnp.stack(cols, axis=1)


if __name__ == "__main__":
    # Shapes consistent with the module defaults: dim_X=32, hidden_layers=(256,), dim_y=4.
    B, dim_X, H, dim_y = 8, 32, 256, 4

    key = jax.random.PRNGKey(0)
    kx, k1, k2, k3, k4 = jax.random.split(key, 5)

    x = jax.random.normal(kx, (B, dim_X), dtype=jnp.float32)
    w1 = jax.random.normal(k1, (dim_y, dim_X, H), dtype=jnp.float32) * 0.1
    b1 = jax.random.normal(k2, (dim_y, 1, H), dtype=jnp.float32) * 0.1
    w2 = jax.random.normal(k3, (dim_y, H, 1), dtype=jnp.float32) * 0.1
    b2 = jax.random.normal(k4, (dim_y, 1, 1), dtype=jnp.float32) * 0.1

    ref = reference(x, w1, b1, w2, b2)

    # f32 path (exact module semantics).
    out = jax.block_until_ready(fully_connected_networks(x, w1, b1, w2, b2))
    assert out.shape == (B, dim_y), out.shape
    assert jnp.allclose(out, ref, atol=1e-4, rtol=1e-4), "f32 mismatch vs reference"

    # bf16-weight fast path (halves W1 DMA traffic; f32 MXU accumulation).
    out_bf16 = jax.block_until_ready(
        fully_connected_networks(x, w1, b1, w2, b2, use_bf16_weights=True))
    assert out_bf16.shape == (B, dim_y), out_bf16.shape
    assert jnp.allclose(out_bf16, ref, atol=1e-1, rtol=1e-1), "bf16 path out of tolerance"

    print("KERNEL_OK")
</pallas_src>

<mosaic_0001>
module attributes {stable_mosaic.version = 11 : i64} {
  func.func @_fused_mlp_kernel(%arg0: i32, %arg1: i32, %arg2: memref<8x32xf32, #tpu.memory_space<vmem>>, %arg3: memref<32x1024xf32, #tpu.memory_space<vmem>>, %arg4: memref<1x1024xf32, #tpu.memory_space<vmem>>, %arg5: memref<1x1024xf32, #tpu.memory_space<vmem>>, %arg6: memref<4xf32, #tpu.memory_space<smem>>, %arg7: memref<8x4xf32, #tpu.memory_space<vmem>>) attributes {dimension_semantics = [#tpu.dimension_semantics<parallel>, #tpu.dimension_semantics<arbitrary>], iteration_bounds = array<i64: 1, 1>, scalar_prefetch = 0 : i64, scratch_operands = 0 : i64, tpu.core_type = #tpu.core_type<tc>, window_params = [{transform_indices = @transform_0, window_bounds = array<i64: 8, 32>}, {transform_indices = @transform_1, window_bounds = array<i64: 32, 1024>}, {transform_indices = @transform_2, window_bounds = array<i64: 1, 1024>}, {transform_indices = @transform_3, window_bounds = array<i64: 1, 1024>}, {transform_indices = @transform_4, window_bounds = array<i64: 4>}, {transform_indices = @transform_5, window_bounds = array<i64: 8, 4>}]} {
    %c0 = arith.constant 0 : index
    %c0_0 = arith.constant 0 : index
    %0 = vector.load %arg2[%c0, %c0_0] : memref<8x32xf32, #tpu.memory_space<vmem>>, vector<8x32xf32>
    %c0_1 = arith.constant 0 : index
    %c0_2 = arith.constant 0 : index
    %1 = vector.load %arg3[%c0_1, %c0_2] : memref<32x1024xf32, #tpu.memory_space<vmem>>, vector<32x1024xf32>
    %cst = arith.constant dense<0.000000e+00> : vector<8x1024xf32>
    %2 = tpu.matmul %0, %1, %cst {dimension_numbers = #tpu.dot_dimension_numbers<[1], [0], [0], [1], [0, 0, 1, 1], [], []>} : vector<8x32xf32>, vector<32x1024xf32>, vector<8x1024xf32> -> vector<8x1024xf32>
    %c0_3 = arith.constant 0 : index
    %c0_4 = arith.constant 0 : index
    %3 = vector.load %arg4[%c0_3, %c0_4] : memref<1x1024xf32, #tpu.memory_space<vmem>>, vector<1x1024xf32>
    %4 = vector.broadcast %3 : vector<1x1024xf32> to vector<8x1024xf32>
    %5 = arith.addf %2, %4 : vector<8x1024xf32>
    %cst_5 = arith.constant 0.000000e+00 : f32
    %6 = vector.broadcast %cst_5 : f32 to vector<8x1024xf32>
    %7 = arith.maximumf %5, %6 : vector<8x1024xf32>
    %c0_6 = arith.constant 0 : index
    %c0_7 = arith.constant 0 : index
    %8 = vector.load %arg5[%c0_6, %c0_7] : memref<1x1024xf32, #tpu.memory_space<vmem>>, vector<1x1024xf32>
    %9 = vector.broadcast %8 : vector<1x1024xf32> to vector<8x1024xf32>
    %10 = arith.mulf %7, %9 : vector<8x1024xf32>
    %11 = vector.extract_strided_slice %10 {offsets = [0, 0], sizes = [8, 256], strides = [1, 1]} : vector<8x1024xf32> to vector<8x256xf32>
    %cst_8 = arith.constant dense<0.000000e+00> : vector<8xf32>
    %12 = vector.multi_reduction <add>, %11, %cst_8 [1] : vector<8x256xf32> to vector<8xf32>
    %13 = vector.shape_cast %12 : vector<8xf32> to vector<8x1xf32>
    %c4_i32 = arith.constant 4 : i32
    %14 = arith.muli %arg1, %c4_i32 : i32
    %c0_i32 = arith.constant 0 : i32
    %15 = arith.addi %14, %c0_i32 : i32
    %16 = arith.index_cast %15 : i32 to index
    %17 = memref.load %arg6[%16] : memref<4xf32, #tpu.memory_space<smem>>
    %18 = vector.broadcast %17 : f32 to vector<8x1xf32>
    %19 = arith.addf %13, %18 : vector<8x1xf32>
    %20 = vector.extract_strided_slice %10 {offsets = [0, 256], sizes = [8, 256], strides = [1, 1]} : vector<8x1024xf32> to vector<8x256xf32>
    %cst_9 = arith.constant dense<0.000000e+00> : vector<8xf32>
    %21 = vector.multi_reduction <add>, %20, %cst_9 [1] : vector<8x256xf32> to vector<8xf32>
    %22 = vector.shape_cast %21 : vector<8xf32> to vector<8x1xf32>
    %c4_i32_10 = arith.constant 4 : i32
    %23 = arith.muli %arg1, %c4_i32_10 : i32
    %c1_i32 = arith.constant 1 : i32
    %24 = arith.addi %23, %c1_i32 : i32
    %25 = arith.index_cast %24 : i32 to index
    %26 = memref.load %arg6[%25] : memref<4xf32, #tpu.memory_space<smem>>
    %27 = vector.broadcast %26 : f32 to vector<8x1xf32>
    %28 = arith.addf %22, %27 : vector<8x1xf32>
    %29 = vector.extract_strided_slice %10 {offsets = [0, 512], sizes = [8, 256], strides = [1, 1]} : vector<8x1024xf32> to vector<8x256xf32>
    %cst_11 = arith.constant dense<0.000000e+00> : vector<8xf32>
    %30 = vector.multi_reduction <add>, %29, %cst_11 [1] : vector<8x256xf32> to vector<8xf32>
    %31 = vector.shape_cast %30 : vector<8xf32> to vector<8x1xf32>
    %c4_i32_12 = arith.constant 4 : i32
    %32 = arith.muli %arg1, %c4_i32_12 : i32
    %c2_i32 = arith.constant 2 : i32
    %33 = arith.addi %32, %c2_i32 : i32
    %34 = arith.index_cast %33 : i32 to index
    %35 = memref.load %arg6[%34] : memref<4xf32, #tpu.memory_space<smem>>
    %36 = vector.broadcast %35 : f32 to vector<8x1xf32>
    %37 = arith.addf %31, %36 : vector<8x1xf32>
    %38 = vector.extract_strided_slice %10 {offsets = [0, 768], sizes = [8, 256], strides = [1, 1]} : vector<8x1024xf32> to vector<8x256xf32>
    %cst_13 = arith.constant dense<0.000000e+00> : vector<8xf32>
    %39 = vector.multi_reduction <add>, %38, %cst_13 [1] : vector<8x256xf32> to vector<8xf32>
    %40 = vector.shape_cast %39 : vector<8xf32> to vector<8x1xf32>
    %c4_i32_14 = arith.constant 4 : i32
    %41 = arith.muli %arg1, %c4_i32_14 : i32
    %c3_i32 = arith.constant 3 : i32
    %42 = arith.addi %41, %c3_i32 : i32
    %43 = arith.index_cast %42 : i32 to index
    %44 = memref.load %arg6[%43] : memref<4xf32, #tpu.memory_space<smem>>
    %45 = vector.broadcast %44 : f32 to vector<8x1xf32>
    %46 = arith.addf %40, %45 : vector<8x1xf32>
    %47 = tpu.concatenate %19, %28, %37, %46 in 1 : vector<8x1xf32>, vector<8x1xf32>, vector<8x1xf32>, vector<8x1xf32> -> vector<8x4xf32>
    %c0_15 = arith.constant 0 : index
    %c0_16 = arith.constant 0 : index
    %48 = vector.load %arg7[%c0_15, %c0_16] : memref<8x4xf32, #tpu.memory_space<vmem>>, vector<8x4xf32>
    tpu.vector_store %arg7[%c0_15, %c0_16], %47 {strides = array<i32>} : memref<8x4xf32, #tpu.memory_space<vmem>>, vector<8x4xf32>,
    return
  }
  func.func @transform_0(%arg0: i32, %arg1: i32) -> (i32, i32) {
    %c0_i32 = arith.constant 0 : i32
    %c0_i32_0 = arith.constant 0 : i32
    return %arg0, %c0_i32 : i32, i32
  }
  func.func @transform_1(%arg0: i32, %arg1: i32) -> (i32, i32) {
    %c0_i32 = arith.constant 0 : i32
    %c0_i32_0 = arith.constant 0 : i32
    return %c0_i32, %arg1 : i32, i32
  }
  func.func @transform_2(%arg0: i32, %arg1: i32) -> (i32, i32) {
    %c0_i32 = arith.constant 0 : i32
    %c0_i32_0 = arith.constant 0 : i32
    return %c0_i32, %arg1 : i32, i32
  }
  func.func @transform_3(%arg0: i32, %arg1: i32) -> (i32, i32) {
    %c0_i32 = arith.constant 0 : i32
    %c0_i32_0 = arith.constant 0 : i32
    return %c0_i32, %arg1 : i32, i32
  }
  func.func @transform_4(%arg0: i32, %arg1: i32) -> i32 {
    %c0_i32 = arith.constant 0 : i32
    %c0_i32_0 = arith.constant 0 : i32
    return %c0_i32 : i32
  }
  func.func @transform_5(%arg0: i32, %arg1: i32) -> (i32, i32) {
    %c0_i32 = arith.constant 0 : i32
    %c0_i32_0 = arith.constant 0 : i32
    return %arg0, %c0_i32 : i32, i32
  }
}

</mosaic_0001>

<bundles_post_ra>
// kernel: tpu_custom_call.1
= control target key start
LH: loop header
LB: loop body
LE: loop exit
PB: predicated region body
PF: predicated region fallthrough
CT: control target
= control target key end

     0   :  { %10 = vsyncpa [#allocation3], 0  ;;  %s580_s0 = inlined_call_operand.hbm [shape: f32[8,32], index: 0, kind: input, shape index: {}]   ;;  %s581_s1 = inlined_call_operand.hbm [shape: f32[32,1024], index: 1, kind: input, shape index: {}]   ;;  %s582_s2 = inlined_call_operand.hbm [shape: f32[1,1024], index: 2, kind: input, shape index: {}]   ;;  %s583_s3 = inlined_call_operand.hbm [shape: f32[1,1024], index: 3, kind: input, shape index: {}]   ;;  %s584_s4 = inlined_call_operand.vmem [shape: f32[4], index: 4, kind: input, shape index: {}]   ;;  %s585_s5 = inlined_call_operand.vmem [shape: f32[8,4], index: 5, kind: output, shape index: {}]  }
   0x1   :  { %11 = vsyncpa [#allocation6], 0 }
   0x2   :  { %12 = vsyncpa [#allocation9], 0  ;;  %s29_s20 = sshll.u32 %s581_s1, 4  ;;  %s30_s20 = int_to_ptr.hbm [resolvable:$true] %s29_s20 }
   0x3   :  { %13 = vsyncpa [#allocation4], 0  ;;  %s517_s21 = smov [#allocation5]   ;;  %s19_s25 = sshll.u32 %s580_s0, 4  ;;  %s20_s25 = int_to_ptr.hbm [resolvable:$true] %s19_s25 }
   0x4   :  { %s31_s22 = sshll.u32 %s517_s21, 4  ;;  %s518_s26 = smov 1024   ;;  %s32_s22 = int_to_ptr.vmem [resolvable:$true] %s31_s22 }
   0x5   :  { %s519_s27 = smov 64   ;;  %s520_s28 = smov [#allocation2]  }
   0x6   :  { %37 = dma.hbm_to_vmem [thread:$0]  %s30_s20, 4096, %s32_s22, [#allocation6], %s518_s26, %s518_s26, %s519_s27  }
   0x7   :  { %s21_s29 = sshll.u32 %s520_s28, 4  ;;  %s43_s7 = sshll.u32 %s582_s2, 4  ;;  %s22_s29 = int_to_ptr.vmem [resolvable:$true] %s21_s29  ;;  %s44_s7 = int_to_ptr.hbm [resolvable:$true] %s43_s7 }
   0x8   :  { %24 = dma.hbm_to_vmem [thread:$0]  %s20_s25, 128, %s22_s29, [#allocation3]  }
   0x9   :  { %s54_s9 = sshll.u32 %s583_s3, 4  ;;  %s521_s10 = smov [#allocation7]   ;;  %s55_s9 = int_to_ptr.hbm [resolvable:$true] %s54_s9 }
   0xa   :  { %s45_s11 = sshll.u32 %s521_s10, 4  ;;  %s522_s0 = smov [#allocation8]   ;;  %s46_s11 = int_to_ptr.vmem [resolvable:$true] %s45_s11 }
   0xb   :  { %48 = dma.hbm_to_vmem [thread:$0]  %s44_s7, 128, %s46_s11, [#allocation6]  }
   0xc   :  { %s56_s12 = sshll.u32 %s522_s0, 4  ;;  %s65_s15 = sshll.u32 %s584_s4, 4  ;;  %s57_s12 = int_to_ptr.vmem [resolvable:$true] %s56_s12  ;;  %s66_s15 = int_to_ptr.vmem [resolvable:$true] %s65_s15 }
   0xd   :  { %59 = dma.hbm_to_vmem [thread:$0]  %s55_s9, 128, %s57_s12, [#allocation9]  }
   0xe   :  { %s523_s2 = smov [#allocation10]  }
   0xf   :  { %68 = dma.vmem_to_smem %s66_s15, 16, %s523_s2, [#allocation4]  }
  0x10   :  { %509 = dma.done.wait [#allocation3], 128  }
  0x11   :  { %510 = vsyncadd [#allocation3], 4294967168 }
  0x12   :  { %511 = dma.done.wait [#allocation6], 4224  }
  0x13   :  { %512 = vsyncadd [#allocation6], 4294963072 }
  0x14   :  { %513 = dma.done.wait [#allocation9], 128  }
  0x15   :  { %514 = vsyncadd [#allocation9], 4294967168 }
  0x16   :  { %515 = dma.done.wait [#allocation4], 16  }
  0x17   :  { %516 = vsyncadd [#allocation4], 4294967280 }
  0x18   :  { %89 = sfence }
  0x19   :  { %v115_v0 = vld [vmem:[#allocation5 + $0xc0] sm:$0xff]  ;;  %v116_v1 = vld [vmem:[#allocation5 + $0xc8] sm:$0xff]  ;;  %v117_v4 = vld [vmem:[#allocation5 + $0xd0] sm:$0xff]  ;;  %vm141_vm0 = vcmask 261120   ;;  %s391_s3 = sld [smem:[#allocation10 + $0x1]]  ;;  %vm367_vm1 = vcmask 7168  }
  0x1a   :  { %v107_v2 = vld [vmem:[#allocation5 + $0x80] sm:$0xff]  ;;  %157 = vmatpush.msra.mxu0 %v115_v0  ;;  %177 = vmatpush.msra.mxu1 %v116_v1  ;;  %v108_v3 = vld [vmem:[#allocation5 + $0x88] sm:$0xff]  ;;  %v118_v5 = vld [vmem:[#allocation5 + $0xd8] sm:$0xff]  ;;  %s343_s4 = sld [smem:[#allocation10]]  ;;  %vm369_vm2 = vcmask 15360   ;;  %vm371_vm3 = vcmask 23552  }
  0x1b   :  { %197 = vmatpush.msra.mxu2 %v117_v4  ;;  %217 = vmatpush.msra.mxu3 %v118_v5  ;;  %v99_v6 = vld [vmem:[#allocation5 + $0x40] sm:$0xff]  ;;  %v100_v7 = vld [vmem:[#allocation5 + $0x48] sm:$0xff]  ;;  %v109_v8 = vld [vmem:[#allocation5 + $0x90] sm:$0xff]  ;;  %s392_s16 = sld [smem:[#allocation10 + $0x2]]  ;;  %vm373_vm4 = vcmask 31744  }
  0x1c   :  { %158 = vmatpush.msra.mxu0 %v107_v2  ;;  %178 = vmatpush.msra.mxu1 %v108_v3  ;;  %v110_v9 = vld [vmem:[#allocation5 + $0x98] sm:$0xff]  ;;  %v91_v10 = vld [vmem:[#allocation5] sm:$0xff]  ;;  %v92_v11 = vld [vmem:[#allocation5 + $0x8] sm:$0xff]  ;;  %s393_s17 = sld [smem:[#allocation10 + $0x3]] }
  0x1d   :  { %198 = vmatpush.msra.mxu2 %v109_v8  ;;  %218 = vmatpush.msra.mxu3 %v110_v9  ;;  %v101_v12 = vld [vmem:[#allocation5 + $0x50] sm:$0xff]  ;;  %v102_v13 = vld [vmem:[#allocation5 + $0x58] sm:$0xff]  ;;  %v119_v15 = vld [vmem:[#allocation5 + $0xe0] sm:$0xff] }
  0x1e   :  { %159 = vmatpush.msra.mxu0 %v99_v6  ;;  %179 = vmatpush.msra.mxu1 %v100_v7  ;;  %v90_v14 = vld [vmem:[#allocation2] sm:$0xff]  ;;  %v120_v16 = vld [vmem:[#allocation5 + $0xe8] sm:$0xff]  ;;  %v93_v17 = vld [vmem:[#allocation5 + $0x10] sm:$0xff] }
  0x1f   :  { %199 = vmatpush.msra.mxu2 %v101_v12  ;;  %219 = vmatpush.msra.mxu3 %v102_v13  ;;  %v94_v18 = vld [vmem:[#allocation5 + $0x18] sm:$0xff]  ;;  %v111_v19 = vld [vmem:[#allocation5 + $0xa0] sm:$0xff]  ;;  %v112_v20 = vld [vmem:[#allocation5 + $0xa8] sm:$0xff] }
  0x20   :  { %160 = vmatpush.msra.mxu0 %v91_v10  ;;  %180 = vmatpush.msra.mxu1 %v92_v11  ;;  %v121_v21 = vld [vmem:[#allocation5 + $0xf0] sm:$0xff]  ;;  %v122_v22 = vld [vmem:[#allocation5 + $0xf8] sm:$0xff]  ;;  %v103_v23 = vld [vmem:[#allocation5 + $0x60] sm:$0xff] }
  0x21   :  { %383 = vmatmul.msk.f32.vlgmr.msra.gmra.mxu0 %vm141_vm0, %v90_v14  ;;  %384 = vmatmul.msk.f32.vlgmr.msra.gmra.mxu1 %vm141_vm0, %v90_v14  ;;  %v104_v24 = vld [vmem:[#allocation5 + $0x68] sm:$0xff]  ;;  %v113_v25 = vld [vmem:[#allocation5 + $0xb0] sm:$0xff]  ;;  %v114_v26 = vld [vmem:[#allocation5 + $0xb8] sm:$0xff] }
  0x22   :  { %237 = vmatpush.msrb.mxu0 %v119_v15  ;;  %257 = vmatpush.msrb.mxu1 %v120_v16  ;;  %v95_v27 = vld [vmem:[#allocation5 + $0x20] sm:$0xff]  ;;  %v96_v28 = vld [vmem:[#allocation5 + $0x28] sm:$0xff]  ;;  %v105_v29 = vld [vmem:[#allocation5 + $0x70] sm:$0xff] }
  0x23   :  { %200 = vmatpush.msra.mxu2 %v93_v17  ;;  %220 = vmatpush.msra.mxu3 %v94_v18  ;;  %v106_v30 = vld [vmem:[#allocation5 + $0x78] sm:$0xff]  ;;  %v97_v31 = vld [vmem:[#allocation5 + $0x30] sm:$0xff]  ;;  %v123_v33 = vld [vmem:[#allocation7] sm:$0xff] }
  0x24   :  { %385 = vmatmul.msk.f32.vlgmr.msra.gmra.mxu2 %vm141_vm0, %v90_v14  ;;  %386 = vmatmul.msk.f32.vlgmr.msra.gmra.mxu3 %vm141_vm0, %v90_v14  ;;  %v98_v32 = vld [vmem:[#allocation5 + $0x38] sm:$0xff]  ;;  %v125_v34 = vperm.slane %v123_v33, 0  ;;  %v126_v35 = vperm.slane %v123_v33, 1  ;;  %v313_v36 = vld [vmem:[#allocation8] sm:$0xff]  ;;  %v127_v47 = vperm.slane %v123_v33, 2  ;;  %v128_v48 = vperm.slane %v123_v33, 3 }
  0x25   :  { %238 = vmatpush.msrb.mxu0 %v111_v19  ;;  %258 = vmatpush.msrb.mxu1 %v112_v20  ;;  %v315_v41 = vperm.slane %v313_v36, 0  ;;  %v316_v42 = vperm.slane %v313_v36, 1  ;;  %v129_v49 = vperm.slane %v123_v33, 4  ;;  %v130_v50 = vperm.slane %v123_v33, 5 }
  0x26   :  { %277 = vmatpush.msrb.mxu2 %v121_v21  ;;  %297 = vmatpush.msrb.mxu3 %v122_v22  ;;  %v317_v55 = vperm.slane %v313_v36, 2  ;;  %v318_v57 = vperm.slane %v313_v36, 3  ;;  %v319_v62 = vperm.slane %v313_v36, 4  ;;  %v320_v63 = vperm.slane %v313_v36, 5 }
  0x27   :  { %239 = vmatpush.msrb.mxu0 %v103_v23  ;;  %259 = vmatpush.msrb.mxu1 %v104_v24  ;;  %v131_v6 = vperm.slane %v123_v33, 6  ;;  %v132_v7 = vperm.slane %v123_v33, 7  ;;  %v321_v15 = vperm.slane %v313_v36, 6  ;;  %v322_v17 = vperm.slane %v313_v36, 7 }
  0x28   :  { %278 = vmatpush.msrb.mxu2 %v113_v25  ;;  %298 = vmatpush.msrb.mxu3 %v114_v26  ;;  %v351_v25 = vstv %s391_s3 }
  0x29   :  { %240 = vmatpush.msrb.mxu0 %v95_v27  ;;  %260 = vmatpush.msrb.mxu1 %v96_v28  ;;  %v344_v27 = vstv %s343_s4  ;;  %v358_v28 = vstv %s392_s16 }
  0x2a   :  { %279 = vmatpush.msrb.mxu2 %v105_v29  ;;  %299 = vmatpush.msrb.mxu3 %v106_v30 }
  0x2b   :  { %387 = vmatmul.msk.f32.vlgmr.msrb.gmra.mxu0 %vm141_vm0, %v90_v14  ;;  %388 = vmatmul.msk.f32.vlgmr.msrb.gmra.mxu1 %vm141_vm0, %v90_v14 }
  0x2c   :  { %280 = vmatpush.msrb.mxu2 %v97_v31  ;;  %300 = vmatpush.msrb.mxu3 %v98_v32  ;;  %v365_v32 = vstv %s393_s17 }
  0x2d   :  { %389 = vmatmul.msk.f32.vlgmr.msrb.gmra.mxu2 %vm141_vm0, %v90_v14  ;;  %390 = vmatmul.msk.f32.vlgmr.msrb.gmra.mxu3 %vm141_vm0, %v90_v14 }
  0x9e   :  { %v162_v37 = vpop.f32.mrf.mxu0  ;;  %v182_v38 = vpop.f32.mrf.mxu1 }
  0x9f   :  { %v163_v39 = vadd.f32 %v162_v37, %v125_v34  ;;  %v183_v40 = vadd.f32 %v182_v38, %v126_v35 }
  0xa1   :  { %v305_v43 = vmax.f32 %v163_v39, 0.0  ;;  %v306_v44 = vmax.f32 %v183_v40, 0.0 }
  0xa3   :  { %v331_v45 = vmul.f32 %v315_v41, %v305_v43  ;;  %v332_v46 = vmul.f32 %v316_v42, %v306_v44 }
  0xa5   :  { %v339_v51 = vadd.f32 %v332_v46, %v331_v45 }
  0xa7   :  { %v202_v52 = vpop.f32.mrf.mxu2  ;;  %v222_v53 = vpop.f32.mrf.mxu3  ;;  %340 = vadd.xlane.f32.xlu0 %v339_v51 }
  0xa8   :  { %v203_v54 = vadd.f32 %v202_v52, %v127_v47  ;;  %v223_v56 = vadd.f32 %v222_v53, %v128_v48  ;;  %v242_v58 = vpop.f32.mrf.mxu0  ;;  %v262_v59 = vpop.f32.mrf.mxu1 }
  0xa9   :  { %v243_v60 = vadd.f32 %v242_v58, %v129_v49  ;;  %v263_v61 = vadd.f32 %v262_v59, %v130_v50 }
  0xaa   :  { %v307_v0 = vmax.f32 %v203_v54, 0.0  ;;  %v308_v1 = vmax.f32 %v223_v56, 0.0 }
  0xab   :  { %v309_v2 = vmax.f32 %v243_v60, 0.0  ;;  %v310_v3 = vmax.f32 %v263_v61, 0.0 }
  0xac   :  { %v333_v4 = vmul.f32 %v317_v55, %v307_v0  ;;  %v334_v5 = vmul.f32 %v318_v57, %v308_v1 }
  0xad   :  { %v335_v8 = vmul.f32 %v319_v62, %v309_v2  ;;  %v336_v9 = vmul.f32 %v320_v63, %v310_v3 }
  0xae   :  { %v346_v10 = vadd.f32 %v334_v5, %v333_v4 }
  0xaf   :  { %v353_v11 = vadd.f32 %v336_v9, %v335_v8 }
  0xb0   :  { %v282_v12 = vpop.f32.mrf.mxu2  ;;  %v302_v13 = vpop.f32.mrf.mxu3  ;;  %347 = vadd.xlane.f32.xlu0 %v346_v10 }
  0xb1   :  { %v283_v14 = vadd.f32 %v282_v12, %v131_v6  ;;  %v303_v16 = vadd.f32 %v302_v13, %v132_v7  ;;  %354 = vadd.xlane.f32.xlu1 %v353_v11 }
  0xb3   :  { %v311_v18 = vmax.f32 %v283_v14, 0.0  ;;  %v312_v19 = vmax.f32 %v303_v16, 0.0 }
  0xb5   :  { %v337_v20 = vmul.f32 %v321_v15, %v311_v18  ;;  %v338_v21 = vmul.f32 %v322_v17, %v312_v19 }
  0xb7   :  { %v360_v22 = vadd.f32 %v338_v21, %v337_v20 }
  0xb9   :  { %361 = vadd.xlane.f32.xlu1 %v360_v22 }
 0x11a   :  { %v341_v23 = vpop.xlane.xlu0 %340 }
 0x11b   :  { %v345_v30 = vadd.f32 %v344_v27, %v341_v23 }
 0x123   :  { %v348_v26 = vpop.xlane.xlu0 %347 }
 0x124   :  { %v355_v24 = vpop.xlane.xlu1 %354  ;;  %v352_v29 = vadd.f32 %v351_v25, %v348_v26 }
 0x125   :  { %v359_v31 = vadd.f32 %v358_v28, %v355_v24 }
 0x126   :  { %v368_v33 = vsel %vm367_vm1, %v345_v30, %v352_v29 }
 0x127   :  { %v370_v36 = vsel %vm369_vm2, %v368_v33, %v359_v31 }
 0x12c   :  { %v362_v34 = vpop.xlane.xlu1 %361 }
 0x12d   :  { %v366_v35 = vadd.f32 %v365_v32, %v362_v34 }
 0x12f   :  { %v372_v37 = vsel %vm371_vm3, %v370_v36, %v366_v35 }
 0x130   :  { %374 = vst.msk [vmem:[%s585_s5] sm:$0xff] %vm373_vm4, %v372_v37 }
 0x131   :  { %379 = vsyncpa [#allocation3], 1 }
 0x132   :  { %380 = vsyncpa [#allocation6], 1 }
 0x133   :  { %381 = vsyncpa [#allocation9], 1 }
 0x134   :  { %382 = vsyncpa [#allocation4], 1 }

</bundles_post_ra>
